<compile_context>
chip_gen: v7x
topology: tpu7x:2x2x1
jax: 0.10.0
libtpu: 0.0.40
codegen_flags: <defaults>
</compile_context>

<pallas_src>
import functools
import math

import jax
import jax.numpy as jnp
from jax import lax
from jax.experimental import pallas as pl
from jax.experimental.pallas import tpu as pltpu

LN_EPS = 1e-5   # torch.nn.LayerNorm default
_LANE = 128
_MIB = 1 << 20


def _round_up(x, m):
    return ((x + m - 1) // m) * m


def _cdiv(a, b):
    return (a + b - 1) // b


# ---------------------------------------------------------------------------
# Kernel
# ---------------------------------------------------------------------------
def _build_fused_mlp_kernel(valid_widths, padded_widths, activate_final):
    """Runs the full layer chain on one batch tile (activations never leave
    VMEM/vregs).

    Ref order: x, then per hidden layer (w, b, gamma, beta[, mask]), then
    final (w, b), then out.  Weights are bf16; activations are cast to bf16
    only at the MXU dot, all other math stays f32.
    """
    num_layers = len(valid_widths)
    needs_mask = tuple(p != v for p, v in zip(padded_widths, valid_widths))

    def kernel(*refs):
        x_ref = refs[0]
        o_ref = refs[-1]
        p = refs[1:-1]

        h = x_ref[...].astype(jnp.float32)
        idx = 0
        for li in range(num_layers - 1):
            w_ref, b_ref, g_ref, beta_ref = p[idx:idx + 4]
            idx += 4
            mask_ref = None
            if needs_mask[li]:
                mask_ref = p[idx]
                idx += 1

            # Linear: bf16 MXU inputs, f32 accumulate; bias + ReLU in f32.
            h = jnp.dot(h.astype(jnp.bfloat16), w_ref[...],
                        preferred_element_type=jnp.float32)
            h = jnp.maximum(h + b_ref[...], 0.0)

            # LayerNorm over the true width.  Padded columns of h are exactly
            # zero (zero-padded W columns / bias), so the plain sum already
            # equals the sum over valid columns; only the squared-deviation
            # term needs the precomputed resident 0/1 mask.
            inv_n = jnp.float32(1.0 / valid_widths[li])
            mean = jnp.sum(h, axis=-1, keepdims=True) * inv_n
            centered = h - mean
            sq = jnp.square(centered)
            if mask_ref is not None:
                sq = sq * mask_ref[...]
            var = jnp.sum(sq, axis=-1, keepdims=True) * inv_n
            h = centered * lax.rsqrt(var + LN_EPS)
            # Padded gamma/beta are zero -> padded activations stay exactly 0.
            h = h * g_ref[...] + beta_ref[...]

        # Final layer: plain Linear (optional activation).
        w_ref, b_ref = p[idx], p[idx + 1]
        h = jnp.dot(h.astype(jnp.bfloat16), w_ref[...],
                    preferred_element_type=jnp.float32) + b_ref[...]
        if activate_final:
            h = jnp.maximum(h, 0.0)
        o_ref[...] = h.astype(o_ref.dtype)

    return kernel


# ---------------------------------------------------------------------------
# Parameter preparation (done ONCE, not per forward call)
# ---------------------------------------------------------------------------
def init_mlp_params(key, input_dim, layer_widths):
    """Mimics torch.nn.Linear init (uniform +/- 1/sqrt(fan_in)) and
    torch.nn.LayerNorm (gamma=1, beta=0).  Weights stored as [in, out]."""
    params = []
    prev = input_dim
    for width in layer_widths:
        key, kw, kb = jax.random.split(key, 3)
        bound = 1.0 / math.sqrt(prev)
        w = jax.random.uniform(kw, (prev, width), jnp.float32, -bound, bound)
        b = jax.random.uniform(kb, (width,), jnp.float32, -bound, bound)
        gamma = jnp.ones((width,), jnp.float32)
        beta = jnp.zeros((width,), jnp.float32)
        params.append((w, b, gamma, beta))
        prev = width
    return params


def prepare_mlp_params(params, input_dim, weight_dtype=jnp.bfloat16):
    """Pad feature dims to multiples of 128 and cast weights to bf16 ONCE.

    Returns (flat_padded_params, meta).  Doing this per forward call would
    add a full HBM read+write of the weight set every step.
    """
    num_layers = len(params)
    widths = tuple(int(w.shape[1]) for (w, _b, _g, _bt) in params)
    widths_pad = tuple(_round_up(n, _LANE) for n in widths)
    in_pad0 = _round_up(int(input_dim), _LANE)

    def _row(v, n_pad):
        v = v.astype(jnp.float32).reshape(1, -1)
        return jnp.pad(v, ((0, 0), (0, n_pad - v.shape[1])))

    flat = []
    prev_pad = in_pad0
    for li, (w, b, g, beta) in enumerate(params):
        n, n_pad = widths[li], widths_pad[li]
        w_p = jnp.pad(w.astype(weight_dtype),
                      ((0, prev_pad - w.shape[0]), (0, n_pad - n)))
        flat += [w_p, _row(b, n_pad)]
        if li < num_layers - 1:   # final layer's LayerNorm is unused (as in PyTorch)
            flat += [_row(g, n_pad), _row(beta, n_pad)]
            if n_pad != n:
                mask = (jnp.arange(n_pad) < n).astype(jnp.float32).reshape(1, -1)
                flat += [mask]
        prev_pad = n_pad

    meta = dict(input_dim=int(input_dim), input_dim_pad=in_pad0,
                widths=widths, widths_pad=widths_pad)
    return flat, meta


# ---------------------------------------------------------------------------
# Forward
# ---------------------------------------------------------------------------
def mlp_forward(x, flat_params, *, meta, activate_final=False, batch_tile=512):
    """Fused MLP forward: one pallas_call for the whole layer chain."""
    B, K0 = x.shape
    assert K0 == meta["input_dim"]
    widths, widths_pad = meta["widths"], meta["widths_pad"]
    K0_pad = meta["input_dim_pad"]
    max_w_pad = max(widths_pad + (K0_pad,))

    # --- batch tiling -------------------------------------------------------
    # Shrink the tile for wide nets: two live TB x width_pad f32 slabs must
    # coexist with resident weights inside v7x's 64 MiB/TC VMEM.
    if max_w_pad >= 2048:
        batch_tile = min(batch_tile, 256)
    B8 = _round_up(B, 8)
    # >=2 grid steps when possible so the "parallel" batch axis can shard
    # across v7x's two TensorCores and the x/out DMA pipeline overlaps.
    min_steps = 2 if B8 >= 16 else 1
    g = max(_cdiv(B8, batch_tile), min_steps)
    TB = _round_up(_cdiv(B8, g), 8)          # caps batch-padding waste at <8 rows/tile
    g = _cdiv(B8, TB)
    B_pad = g * TB

    x_p = jnp.pad(x, ((0, B_pad - B), (0, K0_pad - K0)))

    def _resident(shape):
        # Constant block index -> stays VMEM-resident; single buffer since a
        # second pipeline buffer for a never-changing block is pure waste.
        return pl.BlockSpec(shape, lambda i: (0, 0), pipeline_mode=pl.Buffered(1))

    in_specs = [pl.BlockSpec((TB, K0_pad), lambda i: (i, 0))]
    in_specs += [_resident(tuple(a.shape)) for a in flat_params]

    N_last, N_last_pad = widths[-1], widths_pad[-1]
    kernel = _build_fused_mlp_kernel(widths, widths_pad, activate_final)

    # --- explicit VMEM budget -------------------------------------------------
    resident_bytes = sum(a.size * a.dtype.itemsize for a in flat_params)
    io_bytes = 2 * TB * (K0_pad + N_last_pad) * x.dtype.itemsize   # double-buffered x/out
    act_bytes = 2 * TB * max_w_pad * 4                             # live f32 activation slabs
    vmem_limit = resident_bytes + io_bytes + act_bytes + 16 * _MIB
    try:
        phys_vmem = pltpu.get_tpu_info().vmem_capacity_bytes
    except Exception:
        phys_vmem = 128 * _MIB
    vmem_limit = int(min(max(vmem_limit, 32 * _MIB), int(phys_vmem * 0.8)))

    # TODO(synk): when padded bf16 resident weights exceed ~40 MiB (v7x keeps a
    # copy per TensorCore in its 64 MiB VMEM), add N/K grid axes with a VMEM
    # f32 accumulator + pl.when init/finalize instead of full weight residency;
    # optionally quantize weights to int8 (v6e) / fp8 (v7x).
    out = pl.pallas_call(
        kernel,
        out_shape=jax.ShapeDtypeStruct((B_pad, N_last_pad), x.dtype),
        grid=(B_pad // TB,),
        in_specs=in_specs,
        out_specs=pl.BlockSpec((TB, N_last_pad), lambda i: (i, 0)),
        compiler_params=pltpu.CompilerParams(
            dimension_semantics=("parallel",),
            vmem_limit_bytes=vmem_limit),
    )(x_p, *flat_params)
    return out[:B, :N_last]


# ---------------------------------------------------------------------------
# Pure-JAX reference (same dtype handling as the kernel)
# ---------------------------------------------------------------------------
def mlp_reference(x, params, activate_final=False, weight_dtype=jnp.bfloat16):
    h = x.astype(jnp.float32)
    for (w, b, g, beta) in params[:-1]:
        h = jnp.dot(h.astype(weight_dtype), w.astype(weight_dtype),
                    preferred_element_type=jnp.float32)
        h = jnp.maximum(h + b, 0.0)
        mean = jnp.mean(h, axis=-1, keepdims=True)
        var = jnp.mean(jnp.square(h - mean), axis=-1, keepdims=True)
        h = (h - mean) * lax.rsqrt(var + LN_EPS) * g + beta
    w, b, _, _ = params[-1]
    h = jnp.dot(h.astype(weight_dtype), w.astype(weight_dtype),
                preferred_element_type=jnp.float32) + b
    if activate_final:
        h = jnp.maximum(h, 0.0)
    return h.astype(x.dtype)


if __name__ == "__main__":
    key = jax.random.PRNGKey(0)
    k_in, k_par = jax.random.split(key)

    batch = 8
    input_dim = 32
    layer_widths = [64, 64, 16]

    x = jax.random.normal(k_in, (batch, input_dim), jnp.float32)
    params = init_mlp_params(k_par, input_dim, layer_widths)

    # Pad + cast the whole weight set ONCE (cached outside the jitted forward).
    flat_params, meta = prepare_mlp_params(params, input_dim)

    fwd = jax.jit(functools.partial(mlp_forward, meta=meta, activate_final=False))
    out = jax.block_until_ready(fwd(x, flat_params))

    ref = mlp_reference(x, params)
    assert out.shape == (batch, layer_widths[-1]), out.shape
    assert jnp.allclose(out, ref, atol=1e-2, rtol=1e-2), float(
        jnp.max(jnp.abs(out - ref)))

    print("KERNEL_OK")
</pallas_src>

<mosaic_0001>
module attributes {stable_mosaic.version = 11 : i64} {
  func.func @kernel(%arg0: i32, %arg1: memref<8x128xf32, #tpu.memory_space<vmem>>, %arg2: memref<128x128xbf16, #tpu.memory_space<vmem>>, %arg3: memref<1x128xf32, #tpu.memory_space<vmem>>, %arg4: memref<1x128xf32, #tpu.memory_space<vmem>>, %arg5: memref<1x128xf32, #tpu.memory_space<vmem>>, %arg6: memref<1x128xf32, #tpu.memory_space<vmem>>, %arg7: memref<128x128xbf16, #tpu.memory_space<vmem>>, %arg8: memref<1x128xf32, #tpu.memory_space<vmem>>, %arg9: memref<1x128xf32, #tpu.memory_space<vmem>>, %arg10: memref<1x128xf32, #tpu.memory_space<vmem>>, %arg11: memref<1x128xf32, #tpu.memory_space<vmem>>, %arg12: memref<128x128xbf16, #tpu.memory_space<vmem>>, %arg13: memref<1x128xf32, #tpu.memory_space<vmem>>, %arg14: memref<8x128xf32, #tpu.memory_space<vmem>>) attributes {dimension_semantics = [#tpu.dimension_semantics<parallel>], iteration_bounds = array<i64: 1>, scalar_prefetch = 0 : i64, scratch_operands = 0 : i64, tpu.core_type = #tpu.core_type<tc>, window_params = [{transform_indices = @transform_0, window_bounds = array<i64: 8, 128>}, {pipeline_mode = #tpu.pipeline_mode<synchronous>, transform_indices = @transform_1, window_bounds = array<i64: 128, 128>}, {pipeline_mode = #tpu.pipeline_mode<synchronous>, transform_indices = @transform_2, window_bounds = array<i64: 1, 128>}, {pipeline_mode = #tpu.pipeline_mode<synchronous>, transform_indices = @transform_3, window_bounds = array<i64: 1, 128>}, {pipeline_mode = #tpu.pipeline_mode<synchronous>, transform_indices = @transform_4, window_bounds = array<i64: 1, 128>}, {pipeline_mode = #tpu.pipeline_mode<synchronous>, transform_indices = @transform_5, window_bounds = array<i64: 1, 128>}, {pipeline_mode = #tpu.pipeline_mode<synchronous>, transform_indices = @transform_6, window_bounds = array<i64: 128, 128>}, {pipeline_mode = #tpu.pipeline_mode<synchronous>, transform_indices = @transform_7, window_bounds = array<i64: 1, 128>}, {pipeline_mode = #tpu.pipeline_mode<synchronous>, transform_indices = @transform_8, window_bounds = array<i64: 1, 128>}, {pipeline_mode = #tpu.pipeline_mode<synchronous>, transform_indices = @transform_9, window_bounds = array<i64: 1, 128>}, {pipeline_mode = #tpu.pipeline_mode<synchronous>, transform_indices = @transform_10, window_bounds = array<i64: 1, 128>}, {pipeline_mode = #tpu.pipeline_mode<synchronous>, transform_indices = @transform_11, window_bounds = array<i64: 128, 128>}, {pipeline_mode = #tpu.pipeline_mode<synchronous>, transform_indices = @transform_12, window_bounds = array<i64: 1, 128>}, {transform_indices = @transform_13, window_bounds = array<i64: 8, 128>}]} {
    %c0 = arith.constant 0 : index
    %c0_0 = arith.constant 0 : index
    %0 = vector.load %arg1[%c0, %c0_0] : memref<8x128xf32, #tpu.memory_space<vmem>>, vector<8x128xf32>
    %1 = arith.truncf %0 : vector<8x128xf32> to vector<8x128xbf16>
    %c0_1 = arith.constant 0 : index
    %c0_2 = arith.constant 0 : index
    %2 = vector.load %arg2[%c0_1, %c0_2] : memref<128x128xbf16, #tpu.memory_space<vmem>>, vector<128x128xbf16>
    %cst = arith.constant dense<0.000000e+00> : vector<8x128xf32>
    %3 = tpu.matmul %1, %2, %cst {dimension_numbers = #tpu.dot_dimension_numbers<[1], [0], [0], [1], [0, 0, 1, 1], [], []>} : vector<8x128xbf16>, vector<128x128xbf16>, vector<8x128xf32> -> vector<8x128xf32>
    %c0_3 = arith.constant 0 : index
    %c0_4 = arith.constant 0 : index
    %4 = vector.load %arg3[%c0_3, %c0_4] : memref<1x128xf32, #tpu.memory_space<vmem>>, vector<1x128xf32>
    %5 = vector.broadcast %4 : vector<1x128xf32> to vector<8x128xf32>
    %6 = arith.addf %3, %5 : vector<8x128xf32>
    %cst_5 = arith.constant 0.000000e+00 : f32
    %7 = vector.broadcast %cst_5 : f32 to vector<8x128xf32>
    %8 = arith.maximumf %6, %7 : vector<8x128xf32>
    %cst_6 = arith.constant dense<0.000000e+00> : vector<8xf32>
    %9 = vector.multi_reduction <add>, %8, %cst_6 [1] : vector<8x128xf32> to vector<8xf32>
    %10 = vector.shape_cast %9 : vector<8xf32> to vector<8x1xf32>
    %cst_7 = arith.constant 1.562500e-02 : f32
    %11 = vector.broadcast %cst_7 : f32 to vector<8x1xf32>
    %12 = arith.mulf %10, %11 : vector<8x1xf32>
    %13 = vector.broadcast %12 : vector<8x1xf32> to vector<8x128xf32>
    %14 = arith.subf %8, %13 : vector<8x128xf32>
    %15 = arith.mulf %14, %14 : vector<8x128xf32>
    %c0_8 = arith.constant 0 : index
    %c0_9 = arith.constant 0 : index
    %16 = vector.load %arg6[%c0_8, %c0_9] : memref<1x128xf32, #tpu.memory_space<vmem>>, vector<1x128xf32>
    %17 = vector.broadcast %16 : vector<1x128xf32> to vector<8x128xf32>
    %18 = arith.mulf %15, %17 : vector<8x128xf32>
    %cst_10 = arith.constant dense<0.000000e+00> : vector<8xf32>
    %19 = vector.multi_reduction <add>, %18, %cst_10 [1] : vector<8x128xf32> to vector<8xf32>
    %20 = vector.shape_cast %19 : vector<8xf32> to vector<8x1xf32>
    %cst_11 = arith.constant 1.562500e-02 : f32
    %21 = vector.broadcast %cst_11 : f32 to vector<8x1xf32>
    %22 = arith.mulf %20, %21 : vector<8x1xf32>
    %cst_12 = arith.constant 9.99999974E-6 : f32
    %23 = vector.broadcast %cst_12 : f32 to vector<8x1xf32>
    %24 = arith.addf %22, %23 : vector<8x1xf32>
    %25 = math.rsqrt %24 : vector<8x1xf32>
    %26 = vector.broadcast %25 : vector<8x1xf32> to vector<8x128xf32>
    %27 = arith.mulf %14, %26 : vector<8x128xf32>
    %c0_13 = arith.constant 0 : index
    %c0_14 = arith.constant 0 : index
    %28 = vector.load %arg4[%c0_13, %c0_14] : memref<1x128xf32, #tpu.memory_space<vmem>>, vector<1x128xf32>
    %29 = vector.broadcast %28 : vector<1x128xf32> to vector<8x128xf32>
    %30 = arith.mulf %27, %29 : vector<8x128xf32>
    %c0_15 = arith.constant 0 : index
    %c0_16 = arith.constant 0 : index
    %31 = vector.load %arg5[%c0_15, %c0_16] : memref<1x128xf32, #tpu.memory_space<vmem>>, vector<1x128xf32>
    %32 = vector.broadcast %31 : vector<1x128xf32> to vector<8x128xf32>
    %33 = arith.addf %30, %32 : vector<8x128xf32>
    %34 = arith.truncf %33 : vector<8x128xf32> to vector<8x128xbf16>
    %c0_17 = arith.constant 0 : index
    %c0_18 = arith.constant 0 : index
    %35 = vector.load %arg7[%c0_17, %c0_18] : memref<128x128xbf16, #tpu.memory_space<vmem>>, vector<128x128xbf16>
    %cst_19 = arith.constant dense<0.000000e+00> : vector<8x128xf32>
    %36 = tpu.matmul %34, %35, %cst_19 {dimension_numbers = #tpu.dot_dimension_numbers<[1], [0], [0], [1], [0, 0, 1, 1], [], []>} : vector<8x128xbf16>, vector<128x128xbf16>, vector<8x128xf32> -> vector<8x128xf32>
    %c0_20 = arith.constant 0 : index
    %c0_21 = arith.constant 0 : index
    %37 = vector.load %arg8[%c0_20, %c0_21] : memref<1x128xf32, #tpu.memory_space<vmem>>, vector<1x128xf32>
    %38 = vector.broadcast %37 : vector<1x128xf32> to vector<8x128xf32>
    %39 = arith.addf %36, %38 : vector<8x128xf32>
    %cst_22 = arith.constant 0.000000e+00 : f32
    %40 = vector.broadcast %cst_22 : f32 to vector<8x128xf32>
    %41 = arith.maximumf %39, %40 : vector<8x128xf32>
    %cst_23 = arith.constant dense<0.000000e+00> : vector<8xf32>
    %42 = vector.multi_reduction <add>, %41, %cst_23 [1] : vector<8x128xf32> to vector<8xf32>
    %43 = vector.shape_cast %42 : vector<8xf32> to vector<8x1xf32>
    %cst_24 = arith.constant 1.562500e-02 : f32
    %44 = vector.broadcast %cst_24 : f32 to vector<8x1xf32>
    %45 = arith.mulf %43, %44 : vector<8x1xf32>
    %46 = vector.broadcast %45 : vector<8x1xf32> to vector<8x128xf32>
    %47 = arith.subf %41, %46 : vector<8x128xf32>
    %48 = arith.mulf %47, %47 : vector<8x128xf32>
    %c0_25 = arith.constant 0 : index
    %c0_26 = arith.constant 0 : index
    %49 = vector.load %arg11[%c0_25, %c0_26] : memref<1x128xf32, #tpu.memory_space<vmem>>, vector<1x128xf32>
    %50 = vector.broadcast %49 : vector<1x128xf32> to vector<8x128xf32>
    %51 = arith.mulf %48, %50 : vector<8x128xf32>
    %cst_27 = arith.constant dense<0.000000e+00> : vector<8xf32>
    %52 = vector.multi_reduction <add>, %51, %cst_27 [1] : vector<8x128xf32> to vector<8xf32>
    %53 = vector.shape_cast %52 : vector<8xf32> to vector<8x1xf32>
    %cst_28 = arith.constant 1.562500e-02 : f32
    %54 = vector.broadcast %cst_28 : f32 to vector<8x1xf32>
    %55 = arith.mulf %53, %54 : vector<8x1xf32>
    %cst_29 = arith.constant 9.99999974E-6 : f32
    %56 = vector.broadcast %cst_29 : f32 to vector<8x1xf32>
    %57 = arith.addf %55, %56 : vector<8x1xf32>
    %58 = math.rsqrt %57 : vector<8x1xf32>
    %59 = vector.broadcast %58 : vector<8x1xf32> to vector<8x128xf32>
    %60 = arith.mulf %47, %59 : vector<8x128xf32>
    %c0_30 = arith.constant 0 : index
    %c0_31 = arith.constant 0 : index
    %61 = vector.load %arg9[%c0_30, %c0_31] : memref<1x128xf32, #tpu.memory_space<vmem>>, vector<1x128xf32>
    %62 = vector.broadcast %61 : vector<1x128xf32> to vector<8x128xf32>
    %63 = arith.mulf %60, %62 : vector<8x128xf32>
    %c0_32 = arith.constant 0 : index
    %c0_33 = arith.constant 0 : index
    %64 = vector.load %arg10[%c0_32, %c0_33] : memref<1x128xf32, #tpu.memory_space<vmem>>, vector<1x128xf32>
    %65 = vector.broadcast %64 : vector<1x128xf32> to vector<8x128xf32>
    %66 = arith.addf %63, %65 : vector<8x128xf32>
    %67 = arith.truncf %66 : vector<8x128xf32> to vector<8x128xbf16>
    %c0_34 = arith.constant 0 : index
    %c0_35 = arith.constant 0 : index
    %68 = vector.load %arg12[%c0_34, %c0_35] : memref<128x128xbf16, #tpu.memory_space<vmem>>, vector<128x128xbf16>
    %cst_36 = arith.constant dense<0.000000e+00> : vector<8x128xf32>
    %69 = tpu.matmul %67, %68, %cst_36 {dimension_numbers = #tpu.dot_dimension_numbers<[1], [0], [0], [1], [0, 0, 1, 1], [], []>} : vector<8x128xbf16>, vector<128x128xbf16>, vector<8x128xf32> -> vector<8x128xf32>
    %c0_37 = arith.constant 0 : index
    %c0_38 = arith.constant 0 : index
    %70 = vector.load %arg13[%c0_37, %c0_38] : memref<1x128xf32, #tpu.memory_space<vmem>>, vector<1x128xf32>
    %71 = vector.broadcast %70 : vector<1x128xf32> to vector<8x128xf32>
    %72 = arith.addf %69, %71 : vector<8x128xf32>
    %c0_39 = arith.constant 0 : index
    %c0_40 = arith.constant 0 : index
    %73 = vector.load %arg14[%c0_39, %c0_40] : memref<8x128xf32, #tpu.memory_space<vmem>>, vector<8x128xf32>
    tpu.vector_store %arg14[%c0_39, %c0_40], %72 {strides = array<i32>} : memref<8x128xf32, #tpu.memory_space<vmem>>, vector<8x128xf32>,
    return
  }
  func.func @transform_0(%arg0: i32) -> (i32, i32) {
    %c0_i32 = arith.constant 0 : i32
    %c0_i32_0 = arith.constant 0 : i32
    return %arg0, %c0_i32 : i32, i32
  }
  func.func @transform_1(%arg0: i32) -> (i32, i32) {
    %c0_i32 = arith.constant 0 : i32
    %c0_i32_0 = arith.constant 0 : i32
    %c0_i32_1 = arith.constant 0 : i32
    return %c0_i32, %c0_i32_0 : i32, i32
  }
  func.func @transform_2(%arg0: i32) -> (i32, i32) {
    %c0_i32 = arith.constant 0 : i32
    %c0_i32_0 = arith.constant 0 : i32
    %c0_i32_1 = arith.constant 0 : i32
    return %c0_i32, %c0_i32_0 : i32, i32
  }
  func.func @transform_3(%arg0: i32) -> (i32, i32) {
    %c0_i32 = arith.constant 0 : i32
    %c0_i32_0 = arith.constant 0 : i32
    %c0_i32_1 = arith.constant 0 : i32
    return %c0_i32, %c0_i32_0 : i32, i32
  }
  func.func @transform_4(%arg0: i32) -> (i32, i32) {
    %c0_i32 = arith.constant 0 : i32
    %c0_i32_0 = arith.constant 0 : i32
    %c0_i32_1 = arith.constant 0 : i32
    return %c0_i32, %c0_i32_0 : i32, i32
  }
  func.func @transform_5(%arg0: i32) -> (i32, i32) {
    %c0_i32 = arith.constant 0 : i32
    %c0_i32_0 = arith.constant 0 : i32
    %c0_i32_1 = arith.constant 0 : i32
    return %c0_i32, %c0_i32_0 : i32, i32
  }
  func.func @transform_6(%arg0: i32) -> (i32, i32) {
    %c0_i32 = arith.constant 0 : i32
    %c0_i32_0 = arith.constant 0 : i32
    %c0_i32_1 = arith.constant 0 : i32
    return %c0_i32, %c0_i32_0 : i32, i32
  }
  func.func @transform_7(%arg0: i32) -> (i32, i32) {
    %c0_i32 = arith.constant 0 : i32
    %c0_i32_0 = arith.constant 0 : i32
    %c0_i32_1 = arith.constant 0 : i32
    return %c0_i32, %c0_i32_0 : i32, i32
  }
  func.func @transform_8(%arg0: i32) -> (i32, i32) {
    %c0_i32 = arith.constant 0 : i32
    %c0_i32_0 = arith.constant 0 : i32
    %c0_i32_1 = arith.constant 0 : i32
    return %c0_i32, %c0_i32_0 : i32, i32
  }
  func.func @transform_9(%arg0: i32) -> (i32, i32) {
    %c0_i32 = arith.constant 0 : i32
    %c0_i32_0 = arith.constant 0 : i32
    %c0_i32_1 = arith.constant 0 : i32
    return %c0_i32, %c0_i32_0 : i32, i32
  }
  func.func @transform_10(%arg0: i32) -> (i32, i32) {
    %c0_i32 = arith.constant 0 : i32
    %c0_i32_0 = arith.constant 0 : i32
    %c0_i32_1 = arith.constant 0 : i32
    return %c0_i32, %c0_i32_0 : i32, i32
  }
  func.func @transform_11(%arg0: i32) -> (i32, i32) {
    %c0_i32 = arith.constant 0 : i32
    %c0_i32_0 = arith.constant 0 : i32
    %c0_i32_1 = arith.constant 0 : i32
    return %c0_i32, %c0_i32_0 : i32, i32
  }
  func.func @transform_12(%arg0: i32) -> (i32, i32) {
    %c0_i32 = arith.constant 0 : i32
    %c0_i32_0 = arith.constant 0 : i32
    %c0_i32_1 = arith.constant 0 : i32
    return %c0_i32, %c0_i32_0 : i32, i32
  }
  func.func @transform_13(%arg0: i32) -> (i32, i32) {
    %c0_i32 = arith.constant 0 : i32
    %c0_i32_0 = arith.constant 0 : i32
    return %arg0, %c0_i32 : i32, i32
  }
}

</mosaic_0001>

<bundles_post_ra>
// kernel: mlp_forward.1
= control target key start
LH: loop header
LB: loop body
LE: loop exit
PB: predicated region body
PF: predicated region fallthrough
CT: control target
= control target key end

     0   :  { %18 = vsyncpa [#allocation3], 0  ;;  %s965_s0 = inlined_call_operand.vmem [shape: f32[8,128], index: 0, kind: input, shape index: {}]   ;;  %s966_s1 = inlined_call_operand.hbm [shape: bf16[128,128], index: 1, kind: input, shape index: {}]   ;;  %s967_s2 = inlined_call_operand.vmem [shape: f32[1,128], index: 2, kind: input, shape index: {}]   ;;  %s968_s3 = inlined_call_operand.vmem [shape: f32[1,128], index: 3, kind: input, shape index: {}]   ;;  %s969_s4 = inlined_call_operand.vmem [shape: f32[1,128], index: 4, kind: input, shape index: {}]   ;;  %s970_s5 = inlined_call_operand.vmem [shape: f32[1,128], index: 5, kind: input, shape index: {}]   ;;  %s971_s6 = inlined_call_operand.hbm [shape: bf16[128,128], index: 6, kind: input, shape index: {}]   ;;  %s972_s7 = inlined_call_operand.vmem [shape: f32[1,128], index: 7, kind: input, shape index: {}]   ;;  %s973_s8 = inlined_call_operand.vmem [shape: f32[1,128], index: 8, kind: input, shape index: {}]   ;;  %s974_s9 = inlined_call_operand.vmem [shape: f32[1,128], index: 9, kind: input, shape index: {}]   ;;  %s975_s10 = inlined_call_operand.vmem [shape: f32[1,128], index: 10, kind: input, shape index: {}]   ;;  %s976_s11 = inlined_call_operand.hbm [shape: bf16[128,128], index: 11, kind: input, shape index: {}]   ;;  %s977_s12 = inlined_call_operand.vmem [shape: f32[1,128], index: 12, kind: input, shape index: {}]   ;;  %s978_s13 = inlined_call_operand.hbm [shape: f32[8,128], index: 13, kind: output, shape index: {}]  }
   0x1   :  { %19 = vsyncpa [#allocation6], 0 }
   0x2   :  { %20 = vsyncpa [#allocation4], 0  ;;  %s763_s25 = smov [#allocation5]   ;;  %s764_s27 = smov [#allocation2]  }
   0x3   :  { %s48_s26 = sshll.u32 %s763_s25, 4  ;;  %s28_s28 = sshll.u32 %s764_s27, 4  ;;  %s49_s26 = int_to_ptr.vmem [resolvable:$true] %s48_s26  ;;  %s841_s28 = int_to_ptr.vmem [resolvable:$true] %s28_s28 }
   0x4   :  { %s669_s14 = scalar_lea.hbm %s971_s6, 1024 }
   0x5   :  { %p670_p0 = scmp.ne.s32.totalorder %s971_s6, %s669_s14  ;;  %p673_p1 = scmp.lt.u32.totalorder %s669_s14, %s971_s6 }
   0x7   :  { %p675_p2 = pnand %p673_p1, %p670_p0 }
   0x9   :  { %678 = shalt.err (!%p675_p2)
}
   0xa   :  { %s679_s19 = scalar_lea.vmem %s49_s26, 1024  ;;  %p684_p4 = scmp.lt.s32.totalorder %s49_s26, %s49_s26 }
   0xb   :  { %p680_p3 = scmp.ne.s32.totalorder %s49_s26, %s679_s19  ;;  %p685_p5 = scmp.lt.s32.totalorder %s679_s19, %s679_s19 }
   0xd   :  { %p686_p6 = por %p685_p5, %p684_p4 }
   0xf   :  { %p687_p7 = pnand %p686_p6, %p680_p3 }
  0x11   :  { %690 = shalt.err (!%p687_p7)
}
  0x12   :  { %s765_s20 = smov 64   ;;  %s766_s21 = smov 4  }
  0x13   :  { %54 = dma.hbm_to_vmem [thread:$0]  %s971_s6, 1024, %s49_s26, [#allocation6], %s765_s20, %s765_s20, %s766_s21  }
  0x14   :  { %s691_s27 = scalar_lea.hbm %s966_s1, 1024 }
  0x15   :  { %p692_p8 = scmp.ne.s32.totalorder %s966_s1, %s691_s27  ;;  %p695_p9 = scmp.lt.u32.totalorder %s691_s27, %s966_s1 }
  0x17   :  { %p697_p10 = pnand %p695_p9, %p692_p8 }
  0x19   :  { %700 = shalt.err (!%p697_p10)
}
  0x1a   :  { %s701_s16 = scalar_lea.vmem %s841_s28, 1024  ;;  %p706_p12 = scmp.lt.s32.totalorder %s841_s28, %s841_s28 }
  0x1b   :  { %p702_p11 = scmp.ne.s32.totalorder %s841_s28, %s701_s16  ;;  %p707_p13 = scmp.lt.s32.totalorder %s701_s16, %s701_s16 }
  0x1d   :  { %p708_p0 = por %p707_p13, %p706_p12 }
  0x1f   :  { %p709_p1 = pnand %p708_p0, %p702_p11 }
  0x21   :  { %712 = shalt.err (!%p709_p1)
}
  0x22   :  { %34 = dma.hbm_to_vmem [thread:$0]  %s966_s1, 1024, %s841_s28, [#allocation3], %s765_s20, %s765_s20, %s766_s21  }
  0x23   :  { %s767_s17 = smov [#allocation7]   ;;  %s713_s23 = scalar_lea.hbm %s976_s11, 1024 }
  0x24   :  { %s68_s18 = sshll.u32 %s767_s17, 4  ;;  %p714_p2 = scmp.ne.s32.totalorder %s976_s11, %s713_s23  ;;  %s69_s18 = int_to_ptr.vmem [resolvable:$true] %s68_s18 }
  0x25   :  { %p717_p3 = scmp.lt.u32.totalorder %s713_s23, %s976_s11 }
  0x27   :  { %p719_p4 = pnand %p717_p3, %p714_p2 }
  0x29   :  { %722 = shalt.err (!%p719_p4)
}
  0x2a   :  { %s723_s30 = scalar_lea.vmem %s69_s18, 1024  ;;  %p728_p6 = scmp.lt.s32.totalorder %s69_s18, %s69_s18 }
  0x2b   :  { %p724_p5 = scmp.ne.s32.totalorder %s69_s18, %s723_s30  ;;  %p729_p7 = scmp.lt.s32.totalorder %s723_s30, %s723_s30 }
  0x2d   :  { %p730_p8 = por %p729_p7, %p728_p6 }
  0x2f   :  { %p731_p9 = pnand %p730_p8, %p724_p5 }
  0x31   :  { %734 = shalt.err (!%p731_p9)
}
  0x32   :  { %74 = dma.hbm_to_vmem [thread:$0]  %s976_s11, 1024, %s69_s18, [#allocation6], %s765_s20, %s765_s20, %s766_s21  }
  0x33   :  { %757 = dma.done.wait [#allocation3], 1024  }
  0x34   :  { %758 = vsyncadd [#allocation3], 4294966272 }
  0x35   :  { %759 = dma.done.wait [#allocation6], 2048  }
  0x36   :  { %760 = vsyncadd [#allocation6], 4294965248  ;;  %v768_v0 = vmov 0.0   ;;  %vm769_vm0 = vmmov 0   ;;  %v641_v1 = vld [vmem:[#allocation2] sm:$0xff]   ;;  %v642_v2 = vld [vmem:[#allocation2 + $0x8] sm:$0xff]  }
  0x37   :  { %573 = vmatprep.subr.bf16.mxu0 %v768_v0  ;;  %589 = vmatprep.mubr.msk.bf16.mxu0 %vm769_vm0, %v768_v0  ;;  %v643_v3 = vld [vmem:[#allocation2 + $0x10] sm:$0xff]   ;;  %v644_v4 = vld [vmem:[#allocation2 + $0x18] sm:$0xff]   ;;  %v645_v5 = vld [vmem:[#allocation2 + $0x20] sm:$0xff]   ;;  %s770_s24 = smov [#allocation8]  }
  0x38   :  { %593 = vmatprep.subr.bf16.mxu1 %v768_v0  ;;  %609 = vmatprep.mubr.msk.bf16.mxu1 %vm769_vm0, %v768_v0  ;;  %v646_v6 = vld [vmem:[#allocation2 + $0x28] sm:$0xff]   ;;  %v647_v7 = vld [vmem:[#allocation2 + $0x30] sm:$0xff]   ;;  %v648_v8 = vld [vmem:[#allocation2 + $0x38] sm:$0xff]   ;;  %s503_s25 = sshll.u32 %s770_s24, 4  ;;  %s504_s25 = int_to_ptr.vmem [resolvable:$true] %s503_s25 }
  0x39   :  { %574 = vmatpush3.bf16.msra.mxu0 %v641_v1  ;;  %v87_v9 = vld [vmem:[%s965_s0] sm:$0xff]  ;;  %v649_v18 = vld [vmem:[#allocation5] sm:$0xff]   ;;  %v650_v19 = vld [vmem:[#allocation5 + $0x8] sm:$0xff]   ;;  %p740_p11 = scmp.lt.s32.totalorder %s504_s25, %s504_s25 }
  0x3a   :  { %575 = vmatprep.subr.bf16.mxu0 %v768_v0  ;;  %v88_v10 = vpack.c.bf16 %v87_v9, %v87_v9  ;;  %v513_v11 = vld [vmem:[%s967_s2] ss:$0 sm:$0xff]  ;;  %594 = vmatpush3.bf16.msra.mxu1 %v649_v18  ;;  %v651_v26 = vld [vmem:[#allocation5 + $0x10] sm:$0xff]   ;;  %v653_v28 = vld [vmem:[#allocation5 + $0x20] sm:$0xff]  }
  0x3b   :  { %595 = vmatprep.subr.bf16.mxu1 %v768_v0  ;;  %v522_v23 = vld [vmem:[%s970_s5] ss:$0 sm:$0xff]  ;;  %v654_v29 = vld [vmem:[#allocation5 + $0x28] sm:$0xff]   ;;  %v655_v30 = vld [vmem:[#allocation5 + $0x30] sm:$0xff]  }
  0x3c   :  { %v652_v27 = vld [vmem:[#allocation5 + $0x18] sm:$0xff]   ;;  %v657_v49 = vld [vmem:[#allocation7] sm:$0xff]   ;;  %v658_v50 = vld [vmem:[#allocation7 + $0x8] sm:$0xff]  }
  0x3d   :  { %576 = vmatpush3.bf16.msra.mxu0 %v642_v2  ;;  %v656_v31 = vld [vmem:[#allocation5 + $0x38] sm:$0xff]   ;;  %v659_v57 = vld [vmem:[#allocation7 + $0x10] sm:$0xff]   ;;  %v661_v59 = vld [vmem:[#allocation7 + $0x20] sm:$0xff]  }
  0x3e   :  { %577 = vmatprep.subr.bf16.mxu0 %v768_v0  ;;  %596 = vmatpush3.bf16.msra.mxu1 %v650_v19  ;;  %v523_v36 = vld [vmem:[%s968_s3] ss:$0 sm:$0xff]  ;;  %v662_v60 = vld [vmem:[#allocation7 + $0x28] sm:$0xff]   ;;  %v663_v61 = vld [vmem:[#allocation7 + $0x30] sm:$0xff]  }
  0x3f   :  { %597 = vmatprep.subr.bf16.mxu1 %v768_v0  ;;  %v524_v38 = vld [vmem:[%s969_s4] ss:$0 sm:$0xff] }
  0x40   :  { %v525_v42 = vld [vmem:[%s972_s7] ss:$0 sm:$0xff] }
  0x41   :  { %578 = vmatpush3.bf16.msra.mxu0 %v643_v3  ;;  %v534_v54 = vld [vmem:[%s975_s10] ss:$0 sm:$0xff] }
  0x42   :  { %579 = vmatprep.subr.bf16.mxu0 %v768_v0  ;;  %598 = vmatpush3.bf16.msra.mxu1 %v651_v26  ;;  %v660_v58 = vld [vmem:[#allocation7 + $0x18] sm:$0xff]  }
  0x43   :  { %599 = vmatprep.subr.bf16.mxu1 %v768_v0  ;;  %v664_v62 = vld [vmem:[#allocation7 + $0x38] sm:$0xff]  }
  0x45   :  { %580 = vmatpush3.bf16.msra.mxu0 %v644_v4  ;;  %v535_v4 = vld [vmem:[%s973_s8] ss:$0 sm:$0xff]  ;;  %s735_s8 = scalar_lea.vmem %s504_s25, 128 }
  0x46   :  { %581 = vmatprep.subr.bf16.mxu0 %v768_v0  ;;  %600 = vmatpush3.bf16.msra.mxu1 %v652_v27  ;;  %p736_p10 = scmp.ne.s32.totalorder %s504_s25, %s735_s8  ;;  %p741_p12 = scmp.lt.s32.totalorder %s735_s8, %s735_s8 }
  0x47   :  { %601 = vmatprep.subr.bf16.mxu1 %v768_v0 }
  0x48   :  { %p742_p13 = por %p741_p12, %p740_p11 }
  0x49   :  { %582 = vmatpush3.bf16.msra.mxu0 %v645_v5 }
  0x4a   :  { %583 = vmatprep.subr.bf16.mxu0 %v768_v0  ;;  %602 = vmatpush3.bf16.msra.mxu1 %v653_v28  ;;  %p743_p0 = pnand %p742_p13, %p736_p10 }
  0x4b   :  { %603 = vmatprep.subr.bf16.mxu1 %v768_v0 }
  0x4d   :  { %584 = vmatpush3.bf16.msra.mxu0 %v646_v6  ;;  %v536_v6 = vld [vmem:[%s974_s9] ss:$0 sm:$0xff] }
  0x4e   :  { %585 = vmatprep.subr.bf16.mxu0 %v768_v0  ;;  %604 = vmatpush3.bf16.msra.mxu1 %v654_v29 }
  0x4f   :  { %605 = vmatprep.subr.bf16.mxu1 %v768_v0 }
  0x51   :  { %586 = vmatpush3.bf16.msra.mxu0 %v647_v7 }
  0x52   :  { %587 = vmatprep.subr.bf16.mxu0 %v768_v0  ;;  %606 = vmatpush3.bf16.msra.mxu1 %v655_v30 }
  0x53   :  { %607 = vmatprep.subr.bf16.mxu1 %v768_v0 }
  0x55   :  { %588 = vmatpush3.bf16.msra.mxu0 %v648_v8 }
  0x56   :  { %613 = vmatprep.subr.bf16.mxu0 %v768_v0  ;;  %608 = vmatpush3.bf16.msra.mxu1 %v656_v31 }
  0x58   :  { %590 = vmatmul.mubr.bf16.vlgmr.msra.gmra.mrb[0].mxu0 %v88_v10 }
  0x59   :  { %629 = vmatprep.mubr.msk.bf16.mxu0 %vm769_vm0, %v768_v0  ;;  %614 = vmatpush3.bf16.msra.mxu0 %v657_v49 }
  0x5a   :  { %615 = vmatprep.subr.bf16.mxu0 %v768_v0 }
  0x5d   :  { %616 = vmatpush3.bf16.msra.mxu0 %v658_v50 }
  0x5e   :  { %617 = vmatprep.subr.bf16.mxu0 %v768_v0 }
  0x61   :  { %618 = vmatpush3.bf16.msra.mxu0 %v659_v57 }
  0x62   :  { %619 = vmatprep.subr.bf16.mxu0 %v768_v0 }
  0x65   :  { %620 = vmatpush3.bf16.msra.mxu0 %v660_v58 }
  0x66   :  { %621 = vmatprep.subr.bf16.mxu0 %v768_v0 }
  0x69   :  { %622 = vmatpush3.bf16.msra.mxu0 %v661_v59 }
  0x6a   :  { %623 = vmatprep.subr.bf16.mxu0 %v768_v0 }
  0x6d   :  { %624 = vmatpush3.bf16.msra.mxu0 %v662_v60 }
  0x6e   :  { %625 = vmatprep.subr.bf16.mxu0 %v768_v0 }
  0x71   :  { %626 = vmatpush3.bf16.msra.mxu0 %v663_v61 }
  0x72   :  { %627 = vmatprep.subr.bf16.mxu0 %v768_v0  ;;  %v537_v0 = vld [vmem:[%s977_s12] ss:$0 sm:$0xff] }
  0x75   :  { %628 = vmatpush3.bf16.msra.mxu0 %v664_v62 }
 0x12b   :  { %v194_v12 = vpop.f32.mrb[0].mxu0 }
 0x12c   :  { %v195_v13 = vadd.f32 %v513_v11, %v194_v12  ;;  %v591_v14 = vpop.f32.mrb[1].mxu0 }
 0x12d   :  { %v197_v15 = vpop.f32.mrb[2].mxu0 }
 0x12e   :  { %v200_v16 = vmax.f32 %v195_v13, 0.0  ;;  %v592_v17 = vpop.f32.mrb[3].mxu0 }
 0x130   :  { %201 = vadd.xlane.f32.xlu0 %v200_v16 }
 0x1bd   :  { %v202_v20 = vpop.xlane.xlu0 %201 }
 0x1be   :  { %v203_v21 = vmul.f32 0.015625, %v202_v20 }
 0x1c0   :  { %v204_v22 = vsub.f32 %v200_v16, %v203_v21 }
 0x1c2   :  { %v205_v24 = vmul.f32 %v204_v22, %v204_v22 }
 0x1c4   :  { %v213_v25 = vmul.f32 %v522_v23, %v205_v24 }
 0x1c6   :  { %214 = vadd.xlane.f32.xlu0 %v213_v25 }
 0x253   :  { %v215_v32 = vpop.xlane.xlu0 %214 }
 0x254   :  { %v216_v33 = vmul.f32 0.015625, %v215_v32 }
 0x256   :  { %v217_v34 = vadd.f32 1e-05, %v216_v33 }
 0x258   :  { %665 = vrsqrt.f32 %v217_v34 }
 0x262   :  { %v666_v35 = vpop.eup %665 }
 0x263   :  { %v219_v37 = vmul.f32 %v666_v35, %v204_v22 }
 0x265   :  { %v227_v39 = vmul.f32 %v523_v36, %v219_v37 }
 0x267   :  { %v235_v40 = vadd.f32 %v524_v38, %v227_v39 }
 0x269   :  { %v236_v41 = vpack.c.bf16 %v235_v40, %v235_v40 }
 0x26b   :  { %610 = vmatmul.mubr.bf16.vlgmr.msra.gmra.mrb[0].mxu1 %v236_v41 }
 0x33e   :  { %v342_v43 = vpop.f32.mrb[0].mxu1 }
 0x33f   :  { %v343_v44 = vadd.f32 %v525_v42, %v342_v43  ;;  %v611_v45 = vpop.f32.mrb[1].mxu1 }
 0x340   :  { %v345_v46 = vpop.f32.mrb[2].mxu1 }
 0x341   :  { %v348_v47 = vmax.f32 %v343_v44, 0.0  ;;  %v612_v48 = vpop.f32.mrb[3].mxu1 }
 0x343   :  { %349 = vadd.xlane.f32.xlu1 %v348_v47 }
 0x3d0   :  { %v350_v51 = vpop.xlane.xlu1 %349 }
 0x3d1   :  { %v351_v52 = vmul.f32 0.015625, %v350_v51 }
 0x3d3   :  { %v352_v53 = vsub.f32 %v348_v47, %v351_v52 }
 0x3d5   :  { %v353_v55 = vmul.f32 %v352_v53, %v352_v53 }
 0x3d7   :  { %v361_v56 = vmul.f32 %v534_v54, %v353_v55 }
 0x3d9   :  { %362 = vadd.xlane.f32.xlu1 %v361_v56 }
 0x466   :  { %v363_v63 = vpop.xlane.xlu1 %362 }
 0x467   :  { %v364_v1 = vmul.f32 0.015625, %v363_v63 }
 0x469   :  { %v365_v2 = vadd.f32 1e-05, %v364_v1 }
 0x46b   :  { %667 = vrsqrt.f32 %v365_v2 }
 0x475   :  { %v668_v3 = vpop.eup %667 }
 0x476   :  { %v367_v5 = vmul.f32 %v668_v3, %v352_v53 }
 0x478   :  { %v375_v7 = vmul.f32 %v535_v4, %v367_v5 }
 0x47a   :  { %v383_v8 = vadd.f32 %v536_v6, %v375_v7 }
 0x47c   :  { %v384_v9 = vpack.c.bf16 %v383_v8, %v383_v8 }
 0x47e   :  { %630 = vmatmul.mubr.bf16.vlgmr.msra.gmra.mrb[4].mxu0 %v384_v9 }
 0x551   :  { %v490_v10 = vpop.f32.mrb[4].mxu0 }
 0x552   :  { %v491_v11 = vadd.f32 %v537_v0, %v490_v10  ;;  %v631_v12 = vpop.f32.mrb[5].mxu0 }
 0x553   :  { %v493_v13 = vpop.f32.mrb[6].mxu0 }
 0x554   :  { %496 = vst [vmem:[#allocation8] sm:$0xff] %v491_v11  ;;  %v632_v14 = vpop.f32.mrb[7].mxu0 }
 0x555   :  { %746 = shalt.err (!%p743_p0)
}
 0x556   :  { %s747_s12 = scalar_lea.hbm %s978_s13, 128 }
 0x557   :  { %p748_p1 = scmp.ne.s32.totalorder %s978_s13, %s747_s12  ;;  %p751_p2 = scmp.lt.u32.totalorder %s747_s12, %s978_s13 }
 0x559   :  { %p753_p3 = pnand %p751_p2, %p748_p1 }
 0x55b   :  { %756 = shalt.err (!%p753_p3)
}
 0x55c   :  { %506 = dma.vmem_to_hbm [thread:$0]  %s504_s25, 128, %s978_s13, [#allocation4]  }
 0x55d   :  { %761 = dma.done.wait [#allocation4], 128  }
 0x55e   :  { %762 = vsyncadd [#allocation4], 4294967168 }
 0x55f   :  { %510 = vsyncpa [#allocation3], 1 }
 0x560   :  { %511 = vsyncpa [#allocation6], 1 }
 0x561   :  { %512 = vsyncpa [#allocation4], 1 }

</bundles_post_ra>
